<compile_context>
chip_gen: v7x
topology: tpu7x:2x2x1
jax: 0.10.0
libtpu: 0.0.40
codegen_flags: <defaults>
</compile_context>

<pallas_src>
import jax
import jax.numpy as jnp
from jax.experimental import pallas as pl
from jax.experimental.pallas import tpu as pltpu


def _make_loss_kernel(feat_dim):
    """feat_dim = true (unpadded) C*H*W, used for the per-pair mean."""
    inv_d = 1.0 / float(feat_dim)

    def kernel(mask_ref, mu_ref, lv_ref, x_ref, r_ref,          # inputs
               mse_ref, kld_ref, bsim_ref,                      # outputs (1,1)
               mse_acc, kld_acc, gram_acc):                     # scratch
        pid = pl.program_id(0)
        last = pl.num_programs(0) - 1

        # ---- init accumulators + one-shot KLD -------------------------------
        @pl.when(pid == 0)
        def _init():
            mse_acc[...] = jnp.zeros_like(mse_acc)
            gram_acc[...] = jnp.zeros_like(gram_acc)
            mu = mu_ref[...].astype(jnp.float32)
            lv = lv_ref[...].astype(jnp.float32)
            kld_acc[...] = -0.5 * jnp.sum(
                1.0 + lv - mu * mu - jnp.exp(lv), keepdims=True)

        # ---- streaming per-tile work ----------------------------------------
        x = x_ref[...].astype(jnp.float32)
        r = r_ref[...].astype(jnp.float32)

        # MSE = F.mse_loss(x, recon_x, reduction='sum'), accumulated in f32.
        diff = x - r
        mse_acc[...] += jnp.sum(diff * diff, keepdims=True)

        # Gram accumulation on the MXU: G += r_tile @ r_tile.T  (B x B).
        gram_acc[...] += jax.lax.dot_general(
            r, r, dimension_numbers=(((1,), (1,)), ((), ())),
            preferred_element_type=jnp.float32)

        # ---- finalize: pairwise batch-similarity from Gram ------------------
        @pl.when(pid == last)
        def _finalize():
            g = gram_acc[...]                                   # (B, B)
            b = g.shape[0]
            ii = jax.lax.broadcasted_iota(jnp.int32, (b, b), 0)
            jj = jax.lax.broadcasted_iota(jnp.int32, (b, b), 1)
            eye = ii == jj
            gd = jnp.where(eye, g, 0.0)
            diag_col = jnp.sum(gd, axis=1, keepdims=True)       # (B, 1) ||ri||^2
            diag_row = jnp.sum(gd, axis=0, keepdims=True)       # (1, B) ||rj||^2
            dist2 = diag_col + diag_row - 2.0 * g               # ||ri - rj||^2

            m = mask_ref[...]                                   # upper-tri same-label
            num = jnp.sum(m * dist2, keepdims=True)             # (1,1)
            cnt = jnp.sum(m, keepdims=True)                     # (1,1)
            bsim = jnp.where(cnt > 0.0,
                             (num * inv_d) / jnp.maximum(cnt, 1.0),
                             jnp.zeros_like(num))

            mse_ref[...] = mse_acc[...]
            kld_ref[...] = kld_acc[...]
            bsim_ref[...] = bsim

    return kernel


def _loss_terms(x2d, r2d, mu, logvar, pair_mask, feat_dim, tile_d=512):
    """Returns (MSE_sum, KLD, batch_similarity) as f32 scalars."""
    B, D = x2d.shape
    L = mu.shape[1]

    if D <= tile_d:
        tile = D                       # single full-width block
        d_pad = D
    else:
        tile = tile_d                  # multiple of 128 -> legal lane tiling
        d_pad = ((D + tile - 1) // tile) * tile
        if d_pad != D:                 # zero-pad: contributes 0 to MSE / Gram
            pad = d_pad - D
            x2d = jnp.pad(x2d, ((0, 0), (0, pad)))
            r2d = jnp.pad(r2d, ((0, 0), (0, pad)))
    num_tiles = d_pad // tile

    scalar_out = pl.BlockSpec((1, 1), lambda i: (0, 0))

    grid_spec = pltpu.PrefetchScalarGridSpec(
        num_scalar_prefetch=0,
        grid=(num_tiles,),
        in_specs=[
            pl.BlockSpec((B, B), lambda i: (0, 0)),      # pair mask (grid-invariant)
            pl.BlockSpec((B, L), lambda i: (0, 0)),      # mu        (grid-invariant)
            pl.BlockSpec((B, L), lambda i: (0, 0)),      # logvar    (grid-invariant)
            pl.BlockSpec((B, tile), lambda i: (0, i)),   # x tiles
            pl.BlockSpec((B, tile), lambda i: (0, i)),   # recon tiles
        ],
        out_specs=(scalar_out, scalar_out, scalar_out),
        scratch_shapes=[
            pltpu.VMEM((1, 1), jnp.float32),             # MSE accumulator
            pltpu.VMEM((1, 1), jnp.float32),             # KLD
            pltpu.VMEM((B, B), jnp.float32),             # Gram accumulator
        ],
    )

    mse, kld, bsim = pl.pallas_call(
        _make_loss_kernel(feat_dim),
        out_shape=(jax.ShapeDtypeStruct((1, 1), jnp.float32),
                   jax.ShapeDtypeStruct((1, 1), jnp.float32),
                   jax.ShapeDtypeStruct((1, 1), jnp.float32)),
        grid_spec=grid_spec,
        compiler_params=pltpu.CompilerParams(
            dimension_semantics=("arbitrary",),          # feature axis is a reduction
            vmem_limit_bytes=32 * 1024 * 1024),          # fits v5e/v6e/v7x
    )(pair_mask, mu, logvar, x2d, r2d)
    return mse[0, 0], kld[0, 0], bsim[0, 0]


def material_similarity_loss(x, recon_x, y, mu, logvar,
                             a_mse, a_content, a_style, a_spst, beta,
                             include_batch_similarity_loss=True):
    """Mirrors MaterialSimilarityLoss.forward."""
    B = x.shape[0]
    D = 1
    for s in x.shape[1:]:
        D *= s

    # No dtype cast in the wrapper: kernel loads native dtype, upcasts in VPU.
    x2d = x.reshape(B, D)
    r2d = recon_x.reshape(B, D)

    # Vectorized upper-triangular same-label pair mask (tiny, built once).
    yl = y.astype(jnp.int32)
    same = yl[:, None] == yl[None, :]
    upper = jnp.triu(jnp.ones((B, B), dtype=bool), k=1)
    pair_mask = (same & upper).astype(jnp.float32)

    MSE, KLD, bsim = _loss_terms(x2d, r2d, mu, logvar, pair_mask, D)

    CONTENTLOSS = jnp.zeros((1,), jnp.float32)
    STYLELOSS = jnp.zeros((1,), jnp.float32)

    # batch_difference is a scalar in both branches (shape-stable overall_loss).
    if include_batch_similarity_loss:
        batch_difference = bsim
    else:
        batch_difference = jnp.float32(0.0)

    # TODO(synk): TwoPointSpatialStatsLoss source was not provided; SPST and the
    # autocorrelation maps are returned as zeros rather than faked.
    SPST = jnp.float32(0.0)
    input_autocorr = jnp.zeros_like(x, dtype=jnp.float32)
    recon_autocorr = jnp.zeros_like(recon_x, dtype=jnp.float32)

    overall_loss = (a_mse * MSE + a_spst * SPST + beta * KLD
                    + a_content * CONTENTLOSS + a_style * STYLELOSS
                    + batch_difference)

    return (MSE, CONTENTLOSS, STYLELOSS, SPST, KLD, batch_difference,
            overall_loss, input_autocorr, recon_autocorr)


def _reference(x, recon_x, y, mu, logvar):
    """Plain-JAX reference for the kernel-computed terms (diff formulation)."""
    mse = jnp.sum((x.astype(jnp.float32) - recon_x.astype(jnp.float32)) ** 2)
    kld = -0.5 * jnp.sum(1 + logvar - mu ** 2 - jnp.exp(logvar))
    B = x.shape[0]
    rf = recon_x.reshape(B, -1).astype(jnp.float32)
    loss, count = 0.0, 0.0
    for i in range(B):
        for j in range(i + 1, B):
            w = jnp.where(y[i] == y[j], 1.0, 0.0)
            loss = loss + w * jnp.mean((rf[i] - rf[j]) ** 2)
            count = count + w
    bsim = jnp.where(count > 0, loss / jnp.maximum(count, 1.0), 0.0)
    return mse, kld, bsim


if __name__ == "__main__":
    key = jax.random.PRNGKey(0)
    kx, kr, km, kl = jax.random.split(key, 4)

    B, C, H, W = 4, 4, 16, 16          # D = 1024 -> two 512-lane tiles
    latent = 32

    x = jax.random.normal(kx, (B, C, H, W), dtype=jnp.float32)
    recon_x = jax.random.normal(kr, (B, C, H, W), dtype=jnp.float32)
    y = jnp.array([0, 1, 0, 1], dtype=jnp.int32)
    mu = jax.random.normal(km, (B, latent), dtype=jnp.float32)
    logvar = 0.1 * jax.random.normal(kl, (B, latent), dtype=jnp.float32)

    a_mse, a_content, a_style, a_spst, beta = 1.0, 0.1, 0.1, 0.5, 0.5

    out = material_similarity_loss(x, recon_x, y, mu, logvar,
                                   a_mse, a_content, a_style, a_spst, beta,
                                   include_batch_similarity_loss=True)
    (MSE, CONTENT, STYLE, SPST, KLD, BSIM, OVERALL, in_ac, re_ac) = out
    jax.block_until_ready(OVERALL)

    # sanity-check kernel terms against plain-JAX reference
    mse_ref, kld_ref, bsim_ref = _reference(x, recon_x, y, mu, logvar)
    assert jnp.allclose(MSE, mse_ref, rtol=1e-3, atol=1e-3), (MSE, mse_ref)
    assert jnp.allclose(KLD, kld_ref, rtol=1e-3, atol=1e-3), (KLD, kld_ref)
    assert jnp.allclose(BSIM, bsim_ref, rtol=1e-3, atol=1e-3), (BSIM, bsim_ref)

    print("KERNEL_OK")
</pallas_src>

<mosaic_0001>
module attributes {stable_mosaic.version = 11 : i64} {
  func.func @kernel(%arg0: i32, %arg1: memref<4x4xf32, #tpu.memory_space<vmem>>, %arg2: memref<4x32xf32, #tpu.memory_space<vmem>>, %arg3: memref<4x32xf32, #tpu.memory_space<vmem>>, %arg4: memref<4x512xf32, #tpu.memory_space<vmem>>, %arg5: memref<4x512xf32, #tpu.memory_space<vmem>>, %arg6: memref<1x1xf32, #tpu.memory_space<vmem>>, %arg7: memref<1x1xf32, #tpu.memory_space<vmem>>, %arg8: memref<1x1xf32, #tpu.memory_space<vmem>>, %arg9: memref<1x1xf32, #tpu.memory_space<vmem>>, %arg10: memref<1x1xf32, #tpu.memory_space<vmem>>, %arg11: memref<4x4xf32, #tpu.memory_space<vmem>>) attributes {dimension_semantics = [#tpu.dimension_semantics<arbitrary>], iteration_bounds = array<i64: 2>, scalar_prefetch = 0 : i64, scratch_operands = 3 : i64, tpu.core_type = #tpu.core_type<tc>, window_params = [{pipeline_mode = #tpu.pipeline_mode<synchronous>, transform_indices = @transform_0, window_bounds = array<i64: 4, 4>}, {pipeline_mode = #tpu.pipeline_mode<synchronous>, transform_indices = @transform_1, window_bounds = array<i64: 4, 32>}, {pipeline_mode = #tpu.pipeline_mode<synchronous>, transform_indices = @transform_2, window_bounds = array<i64: 4, 32>}, {transform_indices = @transform_3, window_bounds = array<i64: 4, 512>}, {transform_indices = @transform_4, window_bounds = array<i64: 4, 512>}, {pipeline_mode = #tpu.pipeline_mode<synchronous>, transform_indices = @transform_5, window_bounds = array<i64: 1, 1>}, {pipeline_mode = #tpu.pipeline_mode<synchronous>, transform_indices = @transform_6, window_bounds = array<i64: 1, 1>}, {pipeline_mode = #tpu.pipeline_mode<synchronous>, transform_indices = @transform_7, window_bounds = array<i64: 1, 1>}]} {
    %c0_i32 = arith.constant 0 : i32
    %0 = arith.cmpi eq, %arg0, %c0_i32 : i32
    %1 = arith.extui %0 : i1 to i32
    %c0_i32_0 = arith.constant 0 : i32
    %2 = arith.cmpi ne, %1, %c0_i32_0 : i32
    scf.if %2 {
      %cst_14 = arith.constant 0.000000e+00 : f32
      %22 = vector.broadcast %cst_14 : f32 to vector<1x1xf32>
      %c0_15 = arith.constant 0 : index
      %c0_16 = arith.constant 0 : index
      %23 = vector.load %arg9[%c0_15, %c0_16] : memref<1x1xf32, #tpu.memory_space<vmem>>, vector<1x1xf32>
      tpu.vector_store %arg9[%c0_15, %c0_16], %22 {strides = array<i32>} : memref<1x1xf32, #tpu.memory_space<vmem>>, vector<1x1xf32>,
      %cst_17 = arith.constant 0.000000e+00 : f32
      %24 = vector.broadcast %cst_17 : f32 to vector<4x4xf32>
      %c0_18 = arith.constant 0 : index
      %c0_19 = arith.constant 0 : index
      %25 = vector.load %arg11[%c0_18, %c0_19] : memref<4x4xf32, #tpu.memory_space<vmem>>, vector<4x4xf32>
      tpu.vector_store %arg11[%c0_18, %c0_19], %24 {strides = array<i32>} : memref<4x4xf32, #tpu.memory_space<vmem>>, vector<4x4xf32>,
      %c0_20 = arith.constant 0 : index
      %c0_21 = arith.constant 0 : index
      %26 = vector.load %arg2[%c0_20, %c0_21] : memref<4x32xf32, #tpu.memory_space<vmem>>, vector<4x32xf32>
      %c0_22 = arith.constant 0 : index
      %c0_23 = arith.constant 0 : index
      %27 = vector.load %arg3[%c0_22, %c0_23] : memref<4x32xf32, #tpu.memory_space<vmem>>, vector<4x32xf32>
      %cst_24 = arith.constant 1.000000e+00 : f32
      %28 = vector.broadcast %cst_24 : f32 to vector<4x32xf32>
      %29 = arith.addf %28, %27 : vector<4x32xf32>
      %30 = arith.mulf %26, %26 : vector<4x32xf32>
      %31 = arith.subf %29, %30 : vector<4x32xf32>
      %32 = math.exp %27 : vector<4x32xf32>
      %33 = arith.subf %31, %32 : vector<4x32xf32>
      %34 = vector.shape_cast %33 : vector<4x32xf32> to vector<1x4x32xf32>
      %cst_25 = arith.constant dense<0.000000e+00> : vector<1xf32>
      %35 = vector.multi_reduction <add>, %34, %cst_25 [1, 2] : vector<1x4x32xf32> to vector<1xf32>
      %36 = vector.shape_cast %35 : vector<1xf32> to vector<1x1x1xf32>
      %37 = vector.extract %36[0, 0, 0] : f32 from vector<1x1x1xf32>
      %38 = vector.broadcast %37 : f32 to vector<1x1xf32>
      %cst_26 = arith.constant -5.000000e-01 : f32
      %39 = vector.broadcast %cst_26 : f32 to vector<1x1xf32>
      %40 = arith.mulf %39, %38 : vector<1x1xf32>
      %c0_27 = arith.constant 0 : index
      %c0_28 = arith.constant 0 : index
      %41 = vector.load %arg10[%c0_27, %c0_28] : memref<1x1xf32, #tpu.memory_space<vmem>>, vector<1x1xf32>
      tpu.vector_store %arg10[%c0_27, %c0_28], %40 {strides = array<i32>} : memref<1x1xf32, #tpu.memory_space<vmem>>, vector<1x1xf32>,
    } else {
    }
    %c0 = arith.constant 0 : index
    %c0_1 = arith.constant 0 : index
    %3 = vector.load %arg4[%c0, %c0_1] : memref<4x512xf32, #tpu.memory_space<vmem>>, vector<4x512xf32>
    %c0_2 = arith.constant 0 : index
    %c0_3 = arith.constant 0 : index
    %4 = vector.load %arg5[%c0_2, %c0_3] : memref<4x512xf32, #tpu.memory_space<vmem>>, vector<4x512xf32>
    %5 = arith.subf %3, %4 : vector<4x512xf32>
    %c0_4 = arith.constant 0 : index
    %c0_5 = arith.constant 0 : index
    %6 = vector.load %arg9[%c0_4, %c0_5] : memref<1x1xf32, #tpu.memory_space<vmem>>, vector<1x1xf32>
    %7 = arith.mulf %5, %5 : vector<4x512xf32>
    %8 = vector.shape_cast %7 : vector<4x512xf32> to vector<1x4x512xf32>
    %cst = arith.constant dense<0.000000e+00> : vector<1xf32>
    %9 = vector.multi_reduction <add>, %8, %cst [1, 2] : vector<1x4x512xf32> to vector<1xf32>
    %10 = vector.shape_cast %9 : vector<1xf32> to vector<1x1x1xf32>
    %11 = vector.extract %10[0, 0, 0] : f32 from vector<1x1x1xf32>
    %12 = vector.broadcast %11 : f32 to vector<1x1xf32>
    %13 = arith.addf %6, %12 : vector<1x1xf32>
    %c0_6 = arith.constant 0 : index
    %c0_7 = arith.constant 0 : index
    %14 = vector.load %arg9[%c0_6, %c0_7] : memref<1x1xf32, #tpu.memory_space<vmem>>, vector<1x1xf32>
    tpu.vector_store %arg9[%c0_6, %c0_7], %13 {strides = array<i32>} : memref<1x1xf32, #tpu.memory_space<vmem>>, vector<1x1xf32>,
    %c0_8 = arith.constant 0 : index
    %c0_9 = arith.constant 0 : index
    %15 = vector.load %arg11[%c0_8, %c0_9] : memref<4x4xf32, #tpu.memory_space<vmem>>, vector<4x4xf32>
    %cst_10 = arith.constant dense<0.000000e+00> : vector<4x4xf32>
    %16 = tpu.matmul %4, %4, %cst_10 {dimension_numbers = #tpu.dot_dimension_numbers<[1], [1], [0], [0], [0, 0, 1, 0], [], []>} : vector<4x512xf32>, vector<4x512xf32>, vector<4x4xf32> -> vector<4x4xf32>
    %17 = arith.addf %15, %16 : vector<4x4xf32>
    %c0_11 = arith.constant 0 : index
    %c0_12 = arith.constant 0 : index
    %18 = vector.load %arg11[%c0_11, %c0_12] : memref<4x4xf32, #tpu.memory_space<vmem>>, vector<4x4xf32>
    tpu.vector_store %arg11[%c0_11, %c0_12], %17 {strides = array<i32>} : memref<4x4xf32, #tpu.memory_space<vmem>>, vector<4x4xf32>,
    %c1_i32 = arith.constant 1 : i32
    %19 = arith.cmpi eq, %arg0, %c1_i32 : i32
    %20 = arith.extui %19 : i1 to i32
    %c0_i32_13 = arith.constant 0 : i32
    %21 = arith.cmpi ne, %20, %c0_i32_13 : i32
    scf.if %21 {
      %c0_14 = arith.constant 0 : index
      %c0_15 = arith.constant 0 : index
      %22 = vector.load %arg11[%c0_14, %c0_15] : memref<4x4xf32, #tpu.memory_space<vmem>>, vector<4x4xf32>
      %23 = tpu.iota {dimensions = array<i32: 0>} : vector<4x4xi32>
      %24 = tpu.iota {dimensions = array<i32: 1>} : vector<4x4xi32>
      %25 = arith.cmpi eq, %23, %24 : vector<4x4xi32>
      %cst_16 = arith.constant 0.000000e+00 : f32
      %26 = vector.broadcast %cst_16 : f32 to vector<4x4xf32>
      %27 = arith.select %25, %22, %26 : vector<4x4xi1>, vector<4x4xf32>
      %cst_17 = arith.constant dense<0.000000e+00> : vector<4xf32>
      %28 = vector.multi_reduction <add>, %27, %cst_17 [1] : vector<4x4xf32> to vector<4xf32>
      %29 = vector.shape_cast %28 : vector<4xf32> to vector<4x1xf32>
      %cst_18 = arith.constant dense<0.000000e+00> : vector<4xf32>
      %30 = vector.multi_reduction <add>, %27, %cst_18 [0] : vector<4x4xf32> to vector<4xf32>
      %31 = vector.shape_cast %30 : vector<4xf32> to vector<1x4xf32>
      %32 = vector.broadcast %29 : vector<4x1xf32> to vector<4x4xf32>
      %33 = vector.broadcast %31 : vector<1x4xf32> to vector<4x4xf32>
      %34 = arith.addf %32, %33 : vector<4x4xf32>
      %cst_19 = arith.constant 2.000000e+00 : f32
      %35 = vector.broadcast %cst_19 : f32 to vector<4x4xf32>
      %36 = arith.mulf %35, %22 : vector<4x4xf32>
      %37 = arith.subf %34, %36 : vector<4x4xf32>
      %c0_20 = arith.constant 0 : index
      %c0_21 = arith.constant 0 : index
      %38 = vector.load %arg1[%c0_20, %c0_21] : memref<4x4xf32, #tpu.memory_space<vmem>>, vector<4x4xf32>
      %39 = arith.mulf %38, %37 : vector<4x4xf32>
      %40 = vector.shape_cast %39 : vector<4x4xf32> to vector<1x4x4xf32>
      %cst_22 = arith.constant dense<0.000000e+00> : vector<1xf32>
      %41 = vector.multi_reduction <add>, %40, %cst_22 [1, 2] : vector<1x4x4xf32> to vector<1xf32>
      %42 = vector.shape_cast %41 : vector<1xf32> to vector<1x1x1xf32>
      %43 = vector.extract %42[0, 0, 0] : f32 from vector<1x1x1xf32>
      %44 = vector.broadcast %43 : f32 to vector<1x1xf32>
      %45 = vector.shape_cast %38 : vector<4x4xf32> to vector<1x4x4xf32>
      %cst_23 = arith.constant dense<0.000000e+00> : vector<1xf32>
      %46 = vector.multi_reduction <add>, %45, %cst_23 [1, 2] : vector<1x4x4xf32> to vector<1xf32>
      %47 = vector.shape_cast %46 : vector<1xf32> to vector<1x1x1xf32>
      %48 = vector.extract %47[0, 0, 0] : f32 from vector<1x1x1xf32>
      %49 = vector.broadcast %48 : f32 to vector<1x1xf32>
      %cst_24 = arith.constant 0.000000e+00 : f32
      %50 = vector.broadcast %cst_24 : f32 to vector<1x1xf32>
      %51 = arith.cmpf ogt, %49, %50 : vector<1x1xf32>
      %cst_25 = arith.constant 9.765625E-4 : f32
      %52 = vector.broadcast %cst_25 : f32 to vector<1x1xf32>
      %53 = arith.mulf %44, %52 : vector<1x1xf32>
      %cst_26 = arith.constant 1.000000e+00 : f32
      %54 = vector.broadcast %cst_26 : f32 to vector<1x1xf32>
      %55 = arith.maximumf %49, %54 : vector<1x1xf32>
      %56 = arith.divf %53, %55 : vector<1x1xf32>
      %cst_27 = arith.constant 0.000000e+00 : f32
      %57 = vector.broadcast %cst_27 : f32 to vector<1x1xf32>
      %58 = arith.select %51, %56, %57 : vector<1x1xi1>, vector<1x1xf32>
      %c0_28 = arith.constant 0 : index
      %c0_29 = arith.constant 0 : index
      %59 = vector.load %arg9[%c0_28, %c0_29] : memref<1x1xf32, #tpu.memory_space<vmem>>, vector<1x1xf32>
      %c0_30 = arith.constant 0 : index
      %c0_31 = arith.constant 0 : index
      %60 = vector.load %arg6[%c0_30, %c0_31] : memref<1x1xf32, #tpu.memory_space<vmem>>, vector<1x1xf32>
      tpu.vector_store %arg6[%c0_30, %c0_31], %59 {strides = array<i32>} : memref<1x1xf32, #tpu.memory_space<vmem>>, vector<1x1xf32>,
      %c0_32 = arith.constant 0 : index
      %c0_33 = arith.constant 0 : index
      %61 = vector.load %arg10[%c0_32, %c0_33] : memref<1x1xf32, #tpu.memory_space<vmem>>, vector<1x1xf32>
      %c0_34 = arith.constant 0 : index
      %c0_35 = arith.constant 0 : index
      %62 = vector.load %arg7[%c0_34, %c0_35] : memref<1x1xf32, #tpu.memory_space<vmem>>, vector<1x1xf32>
      tpu.vector_store %arg7[%c0_34, %c0_35], %61 {strides = array<i32>} : memref<1x1xf32, #tpu.memory_space<vmem>>, vector<1x1xf32>,
      %c0_36 = arith.constant 0 : index
      %c0_37 = arith.constant 0 : index
      %63 = vector.load %arg8[%c0_36, %c0_37] : memref<1x1xf32, #tpu.memory_space<vmem>>, vector<1x1xf32>
      tpu.vector_store %arg8[%c0_36, %c0_37], %58 {strides = array<i32>} : memref<1x1xf32, #tpu.memory_space<vmem>>, vector<1x1xf32>,
    } else {
    }
    return
  }
  func.func @transform_0(%arg0: i32) -> (i32, i32) {
    %c0_i32 = arith.constant 0 : i32
    %c0_i32_0 = arith.constant 0 : i32
    %c0_i32_1 = arith.constant 0 : i32
    return %c0_i32, %c0_i32_0 : i32, i32
  }
  func.func @transform_1(%arg0: i32) -> (i32, i32) {
    %c0_i32 = arith.constant 0 : i32
    %c0_i32_0 = arith.constant 0 : i32
    %c0_i32_1 = arith.constant 0 : i32
    return %c0_i32, %c0_i32_0 : i32, i32
  }
  func.func @transform_2(%arg0: i32) -> (i32, i32) {
    %c0_i32 = arith.constant 0 : i32
    %c0_i32_0 = arith.constant 0 : i32
    %c0_i32_1 = arith.constant 0 : i32
    return %c0_i32, %c0_i32_0 : i32, i32
  }
  func.func @transform_3(%arg0: i32) -> (i32, i32) {
    %c0_i32 = arith.constant 0 : i32
    %c0_i32_0 = arith.constant 0 : i32
    return %c0_i32, %arg0 : i32, i32
  }
  func.func @transform_4(%arg0: i32) -> (i32, i32) {
    %c0_i32 = arith.constant 0 : i32
    %c0_i32_0 = arith.constant 0 : i32
    return %c0_i32, %arg0 : i32, i32
  }
  func.func @transform_5(%arg0: i32) -> (i32, i32) {
    %c0_i32 = arith.constant 0 : i32
    %c0_i32_0 = arith.constant 0 : i32
    %c0_i32_1 = arith.constant 0 : i32
    return %c0_i32, %c0_i32_0 : i32, i32
  }
  func.func @transform_6(%arg0: i32) -> (i32, i32) {
    %c0_i32 = arith.constant 0 : i32
    %c0_i32_0 = arith.constant 0 : i32
    %c0_i32_1 = arith.constant 0 : i32
    return %c0_i32, %c0_i32_0 : i32, i32
  }
  func.func @transform_7(%arg0: i32) -> (i32, i32) {
    %c0_i32 = arith.constant 0 : i32
    %c0_i32_0 = arith.constant 0 : i32
    %c0_i32_1 = arith.constant 0 : i32
    return %c0_i32, %c0_i32_0 : i32, i32
  }
}

</mosaic_0001>

<bundles_post_ra>
// kernel: tpu_custom_call.1
= control target key start
LH: loop header
LB: loop body
LE: loop exit
PB: predicated region body
PF: predicated region fallthrough
CT: control target
= control target key end

     0   :  { %13 = vsyncpa [#allocation6], 0  ;;  %s1485_s0 = inlined_call_operand.hbm [shape: f32[4,4], index: 0, kind: input, shape index: {}]   ;;  %s1486_s1 = inlined_call_operand.hbm [shape: f32[4,32], index: 1, kind: input, shape index: {}]   ;;  %s1487_s2 = inlined_call_operand.vmem [shape: f32[4,32], index: 2, kind: input, shape index: {}]   ;;  %s1488_s3 = inlined_call_operand.hbm [shape: f32[4,1024], index: 3, kind: input, shape index: {}]   ;;  %s1489_s4 = inlined_call_operand.hbm [shape: f32[4,1024], index: 4, kind: input, shape index: {}]   ;;  %s1490_s5 = inlined_call_operand.hbm [shape: f32[1,1], index: 5, kind: output, shape index: {0}]   ;;  %s1491_s6 = inlined_call_operand.hbm [shape: f32[1,1], index: 6, kind: output, shape index: {1}]   ;;  %s1492_s7 = inlined_call_operand.hbm [shape: f32[1,1], index: 7, kind: output, shape index: {2}]  }
   0x1   :  { %14 = vsyncpa [#allocation9], 0 }
   0x2   :  { %15 = vsyncpa [#allocation7], 0 }
   0x3   :  { %16 = vsyncpa [#allocation14], 0  ;;  %s1175_s24 = smov 0   ;;  %s1177_s25 = smov 0  }
   0x4   :  { %s1179_s26 = smov 0   ;;  %s1181_s27 = smov 0  }
   0x5 LB: > { %s1194_s28 = sadd.s32 4294967295, %s1125_s27   ;;  %p105_p0 = scmp.ne.s32.totalorder %s1117_s25, %s1113_s24  ;;  %s1125_s27 = sphi %s1181_s27, %s1524_s27   ;;  %s1121_s26 = sphi %s1179_s26, %s1523_s26   ;;  %s1117_s25 = sphi %s1177_s25, %s1522_s25   ;;  %s1113_s24 = sphi %s1175_s24, %s1521_s24  }
   0x6   : > { %p1493_p1 = scmp.eq.s32.totalorder %s1194_s28, 0  ;;  %p753_p2 = scmp.ge.s32.totalorder %s1125_s27, 1 }
   0x7   : > { %p205_p3 = scmp.lt.s32.totalorder %s1125_s27, 3  ;;  %s1127_s8 = smov [#allocation5]  }
   0x8   : > { %p1203_p5 = por %p1493_p1, %p105_p0  ;;  %s218_s9 = sshll.u32 %s1127_s8, 4  ;;  %s219_s9 = int_to_ptr.vmem [resolvable:$true] %s218_s9 }
   0x9   : > { %p1207_p6 = pnand %p753_p2, %p205_p3  ;;  %s1214_s10 = sadd.s32 1, %s1125_s27  }
   0xa   : > { %s1501_s29 = scalar_select %p1203_p5, 1, 0 }
   0xb   : > { %s1502_s30 = scalar_select %p1207_p6, 1, 0 }
   0xc   : > { %p812_p7 = pneg %p1207_p6  ;;  %s89_s12 = ssub.s32 %s1125_s27, %s1214_s10 }
   0xd   : > { %p1224_p9 = scmp.eq.s32.totalorder %s89_s12, 0  ;;  %s92_s14 = sadd.s32 1, %s1121_s26 }
   0xe   : > { %p1218_p8 = pnand %p812_p7, %p1493_p1  ;;  %s881_s17 = scalar_lea.hbm %s1485_s0, 64 }
   0xf   : > { %s1504_s13 = scalar_select %p1224_p9, 1, 0 }
  0x10   : > { %p882_p11 = scmp.ne.s32.totalorder %s1485_s0, %s881_s17  ;;  %p1497_p12 = pneg %p1218_p8 }
  0x11   : > { %p888_p2 = scmp.lt.u32.totalorder %s881_s17, %s1485_s0 }
  0x12   : > { %p884_p13 = pnand %p1497_p12, %p882_p11 }
  0x14   : > { %p885_p0 = pneg %p884_p13 }
  0x16   : > { %p890_p3 = pnand %p888_p2, %p885_p0 }
  0x18   : > { %893 = shalt.err (!%p890_p3)
}
  0x19   : > { %s894_s22 = scalar_lea.vmem %s219_s9, 64  ;;  %p902_p10 = scmp.lt.s32.totalorder %s219_s9, %s219_s9 }
  0x1a   : > { %p895_p7 = scmp.ne.s32.totalorder %s219_s9, %s894_s22  ;;  %p903_p5 = scmp.lt.s32.totalorder %s894_s22, %s894_s22 }
  0x1c   : > { %p897_p4 = pnand %p895_p7, %p1497_p12  ;;  %p904_p6 = por %p903_p5, %p902_p10 }
  0x1e   : > { %p898_p1 = pneg %p897_p4 }
  0x20   : > { %p905_p9 = pnand %p904_p6, %p898_p1 }
  0x22   : > { %908 = shalt.err (!%p905_p9)
}
  0x23   : > { %815 = dma.hbm_to_vmem [thread:$0]  (!%p1218_p8), %s1485_s0, 64, %s219_s9, [#allocation6]  }
  0x24   : > { %p1505_p4 = scmp.ne.s32.totalorder %s1504_s13, 0  ;;  %p100_p1 = scmp.eq.s32.totalorder %s1125_s27, 0 }
  0x25   : > { %p828_p5 = scmp.lt.s32.totalorder %s1125_s27, 2  ;;  %s243_s12 = sand.u32 1, %s1125_s27  }
  0x26   : > { %s1256_s8 = scalar_select %p1505_p4, %s1121_s26, %s92_s14  }
  0x27   : > { %s245_s15 = sand.u32 1, %s1121_s26   ;;  %p1506_p6 = scmp.ne.s32.totalorder %s1121_s26, %s1117_s25 }
  0x28   : > { %s1265_s16 = sshll.u32 %s245_s15, 4  ;;  %s1496_s17 = sshll.u32 %s1125_s27, 8 }
  0x29   : > { %p101_p9 = por %p100_p1, %p1506_p6  ;;  %s1273_s20 = scalar_lea.hbm %s1488_s3, %s1496_s17 }
  0x2a   : > { %s247_s9 = scalar_lea.vmem [#allocation10], %s1265_s16  ;;  %s1128_s21 = smov [#allocation8]  }
  0x2b   : > { %s255_s13 = sshll.u32 %s247_s9, 4  ;;  %p1276_p10 = pnand %p828_p5, %p101_p9  ;;  %s1280_s13 = int_to_ptr.vmem [resolvable:$true] %s255_s13 }
  0x2c   : > { %s1282_s22 = sshll.u32 %s1128_s21, 4  ;;  %s1284_s23 = scalar_lea.sflag [#allocation6], %s243_s12  ;;  %s230_s22 = int_to_ptr.vmem [resolvable:$true] %s1282_s22 }
  0x2d   : > { %s1507_s14 = scalar_select %p1276_p10, 1, 0 }
  0x2e   : > { %s909_s24 = scalar_lea.hbm %s1273_s20, 256  ;;  %p1498_p13 = pneg %p1276_p10 }
  0x2f   : > { %p910_p11 = scmp.ne.s32.totalorder %s1273_s20, %s909_s24  ;;  %s914_s19 = scalar_lea.hbm %s1488_s3, 512 }
  0x30   : > { %p915_p3 = scmp.lt.u32.totalorder %s1273_s20, %s1488_s3  ;;  %p916_p7 = scmp.lt.u32.totalorder %s914_s19, %s909_s24 }
  0x31   : > { %p912_p0 = pnand %p1498_p13, %p910_p11  ;;  %p918_p1 = scmp.lt.u32.totalorder %s909_s24, %s1273_s20 }
  0x32   : > { %p917_p4 = por %p916_p7, %p915_p3 }
  0x33   : > { %p913_p2 = pneg %p912_p0 }
  0x34   : > { %p919_p5 = por %p918_p1, %p917_p4 }
  0x36   : > { %p920_p6 = pnand %p919_p5, %p913_p2 }
  0x38   : > { %923 = shalt.err (!%p920_p6)
}
  0x39   : > { %s924_s12 = scalar_lea.vmem %s1280_s13, 256  ;;  %s1129_s21 = smov [#allocation10]  }
  0x3a   : > { %p925_p9 = scmp.ne.s32.totalorder %s1280_s13, %s924_s12  ;;  %s929_s15 = sshll.u32 %s1129_s21, 4  ;;  %s930_s15 = int_to_ptr.vmem [resolvable:$false] %s929_s15 }
  0x3b   : > { %s931_s17 = scalar_lea.vmem %s930_s15, 512  ;;  %p932_p12 = scmp.lt.s32.totalorder %s1280_s13, %s930_s15 }
  0x3c   : > { %p927_p11 = pnand %p925_p9, %p1498_p13  ;;  %p933_p3 = scmp.lt.s32.totalorder %s931_s17, %s924_s12 }
  0x3e   : > { %p928_p0 = pneg %p927_p11  ;;  %p934_p7 = por %p933_p3, %p932_p12 }
  0x40   : > { %p935_p4 = pnand %p934_p7, %p928_p0 }
  0x42   : > { %938 = shalt.err (!%p935_p4)
}
  0x43   : > { %822 = dma.hbm_to_vmem [thread:$0]  (!%p1276_p10), %s1273_s20, 256, %s1280_s13, %s1284_s23  }
  0x44   : > { %s939_s19 = scalar_lea.hbm %s1486_s1, 64  ;;  %p1508_p12 = pneg %p1218_p8 }
  0x45   : > { %p940_p2 = scmp.ne.s32.totalorder %s1486_s1, %s939_s19  ;;  %p946_p6 = scmp.lt.u32.totalorder %s939_s19, %s1486_s1 }
  0x47   : > { %p942_p1 = pnand %p940_p2, %p1508_p12 }
  0x49   : > { %p943_p5 = pneg %p942_p1 }
  0x4b   : > { %p948_p9 = pnand %p946_p6, %p943_p5 }
  0x4d   : > { %951 = shalt.err (!%p948_p9)
}
  0x4e   : > { %s952_s20 = scalar_lea.vmem %s230_s22, 64  ;;  %p1509_p0 = pmov %p1508_p12 }
  0x4f   : > { %p953_p11 = scmp.ne.s32.totalorder %s230_s22, %s952_s20  ;;  %p960_p4 = scmp.lt.s32.totalorder %s230_s22, %s230_s22 }
  0x50   : > { %p961_p13 = scmp.lt.s32.totalorder %s952_s20, %s952_s20 }
  0x51   : > { %p955_p3 = pnand %p953_p11, %p1509_p0 }
  0x52   : > { %p962_p10 = por %p961_p13, %p960_p4 }
  0x53   : > { %p956_p7 = pneg %p955_p3 }
  0x55   : > { %p963_p2 = pnand %p962_p10, %p956_p7 }
  0x57   : > { %966 = shalt.err (!%p963_p2)
}
  0x58   : > { %818 = dma.hbm_to_vmem [thread:$0]  (!%p1218_p8), %s1486_s1, 64, %s230_s22, [#allocation9]  }
  0x59   : > { %s1510_s24 = sshll.u32 %s1125_s27, 8  ;;  %s266_s21 = scalar_lea.vmem [#allocation11], %s1265_s16 }
  0x5a   : > { %s1338_s9 = scalar_lea.hbm %s1489_s4, %s1510_s24  ;;  %s274_s12 = sshll.u32 %s266_s21, 4  ;;  %s275_s12 = int_to_ptr.vmem [resolvable:$true] %s274_s12 }
  0x5b   : > { %s967_s11 = scalar_lea.hbm %s1338_s9, 256  ;;  %p1511_p13 = scmp.ne.s32.totalorder %s1507_s14, 0 }
  0x5c   : > { %p968_p10 = scmp.ne.s32.totalorder %s1338_s9, %s967_s11  ;;  %s972_s15 = scalar_lea.hbm %s1489_s4, 512 }
  0x5d   : > { %p1512_p12 = pneg %p1511_p13  ;;  %p973_p8 = scmp.lt.u32.totalorder %s1338_s9, %s1489_s4 }
  0x5e   : > { %p974_p6 = scmp.lt.u32.totalorder %s972_s15, %s967_s11  ;;  %p976_p11 = scmp.lt.u32.totalorder %s967_s11, %s1338_s9 }
  0x5f   : > { %p970_p1 = pnand %p968_p10, %p1512_p12 }
  0x60   : > { %p975_p9 = por %p974_p6, %p973_p8 }
  0x61   : > { %p971_p5 = pneg %p970_p1 }
  0x62   : > { %p977_p0 = por %p976_p11, %p975_p9 }
  0x64   : > { %p978_p3 = pnand %p977_p0, %p971_p5 }
  0x66   : > { %981 = shalt.err (!%p978_p3)
}
  0x67   : > { %s982_s16 = scalar_lea.vmem %s275_s12, 256  ;;  %p1513_p4 = pmov %p1512_p12 }
  0x68   : > { %p983_p7 = scmp.ne.s32.totalorder %s275_s12, %s982_s16  ;;  %s1130_s17 = smov [#allocation11]  }
  0x69   : > { %s987_s24 = sshll.u32 %s1130_s17, 4  ;;  %s988_s24 = int_to_ptr.vmem [resolvable:$false] %s987_s24 }
  0x6a   : > { %p985_p2 = pnand %p983_p7, %p1513_p4  ;;  %s989_s18 = scalar_lea.vmem %s988_s24, 512 }
  0x6b   : > { %p990_p12 = scmp.lt.s32.totalorder %s275_s12, %s988_s24  ;;  %p991_p1 = scmp.lt.s32.totalorder %s989_s18, %s982_s16 }
  0x6c   : > { %p986_p10 = pneg %p985_p2 }
  0x6d   : > { %p992_p6 = por %p991_p1, %p990_p12 }
  0x6f   : > { %p993_p8 = pnand %p992_p6, %p986_p10 }
  0x71   : > { %996 = shalt.err (!%p993_p8)
}
  0x72   : > { %825 = dma.hbm_to_vmem [thread:$0]  (!%p1511_p13), %s1338_s9, 256, %s275_s12, %s1284_s23  }
  0x73   : > { %p1514_p5 = scmp.ne.s32.totalorder %s1502_s30, 0 }
  0x74   : > { %p1515_p9 = scmp.eq.s32.totalorder (!%p1514_p5), %s1194_s28, 0 }
  0x75   : > { %283 = sbr.rel (%p1514_p5) target bundleno = 1035 (0x40b), region = 40 }
  0x7c   : > { %1092 = dma.done.wait (%p1515_p9), [#allocation6], 64   ;;  %p1516_p11 = pmov %p1515_p9 }
  0x7d   : > { %p1517_p0 = pmov %p1515_p9 }
  0x7e   : > { %1094 = vsyncadd (%p1516_p11), [#allocation6], 4294967232 }
  0x7f   : > { %1096 = dma.done.wait (%p1517_p0), [#allocation9], 64   ;;  %p1518_p3 = pmov %p1517_p0 }
  0x80   : > { %s293_s14 = sand.u32 1, %s1194_s28   ;;  %s295_s23 = sand.u32 1, %s1117_s25  }
  0x81   : > { %1098 = vsyncadd (%p1518_p3), [#allocation9], 4294967232  ;;  %s1373_s19 = sshll.u32 %s295_s23, 4  ;;  %s294_s30 = scalar_lea.sflag [#allocation6], %s293_s14 }
  0x82   : > { %s297_s9 = scalar_lea.vmem [#allocation10], %s1373_s19  ;;  %p1519_p13 = scmp.ne.s32.totalorder %s1501_s29, 0 }
  0x84   : > { %1100 = dma.done.wait (%p1519_p13), %s294_s30, 512  }
  0x85   : > { %1102 = vsyncadd (%p1519_p13), %s294_s30, 4294966784  ;;  %s306_s21 = scalar_lea.vmem [#allocation11], %s1373_s19  ;;  %p1520_p7 = scmp.ne.s32.totalorder %s1194_s28, 0 }
  0x86   : > { %v348_v0 = vld [vmem:[%s1487_s2] sm:$0xf] (!%p1520_p7)  ;;  %v347_v2 = vld [vmem:[#allocation8] sm:$0xf] (!%p1520_p7)  ;;  %vm355_vm0 = vcmask (!%p1520_p7), 257024   ;;  %vm343_vm1 = vcmask (!%p1520_p7), 0  }
  0x87   : > { %342 = sbr.rel (%p1520_p7) target bundleno = 359 (0x167), region = 60  ;;  %v352_v1 = vmul.f32 (!%p1520_p7), 1.442695, %v348_v0  ;;  %v349_v3 = vadd.f32 (!%p1520_p7), 1.0, %v348_v0  ;;  %v350_v4 = vmul.f32 (!%p1520_p7), %v347_v2, %v347_v2  ;;  %vm345_vm2 = vcmask (!%p1520_p7), 27648  }
  0x88   : > { %v1131_v9 = vmov (!%p1520_p7), 0.0  }
  0x89   : > { %875 = vpow2.f32 (!%p1520_p7), %v352_v1  ;;  %v351_v5 = vsub.f32 (!%p1520_p7), %v349_v3, %v350_v4  ;;  %344 = vst.msk [vmem:[#allocation2] sm:$0x1] (!%p1520_p7), %vm343_vm1, %v1131_v9 }
  0x8a   : > { %346 = vst.msk [vmem:[#allocation4] sm:$0xf] (!%p1520_p7), %vm345_vm2, %v1131_v9 }
  0x93   : > { %v876_v6 = vpop.eup %875 }
  0x94   : > { %v354_v7 = vsub.f32 %v351_v5, %v876_v6 }
  0x96   : > { %v356_v8 = vsel %vm355_vm0, %v354_v7, 0.0 }
  0x97   : > { %357 = vadd.xlane.f32.xlu0 %v356_v8 }
 0x124   : > { %v358_v10 = vpop.xlane.xlu0 %357 }
 0x125   : > { %v359_v11 = vrot.slane %v358_v10, 4 }
 0x127   : > { %v360_v12 = vadd.f32 %v359_v11, %v358_v10 }
 0x129   : > { %v361_v13 = vrot.slane %v360_v12, 2 }
 0x12b   : > { %v362_v14 = vadd.f32 %v361_v13, %v360_v12 }
 0x12d   : > { %v363_v15 = vrot.slane %v362_v14, 1 }
 0x12f   : > { %v364_v16 = vadd.f32 %v363_v15, %v362_v14 }
 0x131   : > { %780 = vpush %v364_v16 }
 0x162   : > { %s781_s29 = spop %780 }
 0x163   : > { %v366_v17 = vstv %s781_s29 }
 0x164   : > { %v367_v18 = vmul.f32 -0.5, %v366_v17 }
 0x166   : > { %368 = vst.msk [vmem:[#allocation3] sm:$0x1] %vm343_vm1, %v367_v18 }
 0x167 PF: > { %v371_v19 = vld [vmem:[%s306_s21] sm:$0xff]  ;;  %v372_v20 = vld [vmem:[%s306_s21 + $0x8] sm:$0xff]  ;;  %vm384_vm3 = vcmask 1043456   ;;  %vm403_vm4 = vcmask 0   ;;  %vm553_vm5 = vcmask 27648   ;;  %p769_p4 = scmp.ne.s32.totalorder %s1194_s28, 1 }
 0x168   : > { %v369_v21 = vld [vmem:[%s297_s9] sm:$0xff]  ;;  %v408_v22 = vcombine.high %v371_v19, %v371_v19  ;;  %v409_v23 = vcombine.high %v372_v20, %v372_v20  ;;  %v370_v24 = vld [vmem:[%s297_s9 + $0x8] sm:$0xff]  ;;  %v560_v55 = vlaneseq (!%p769_p4) }
 0x169   : > { %v373_v25 = vsub.f32 %v369_v21, %v371_v19  ;;  %v374_v26 = vsub.f32 %v370_v24, %v372_v20  ;;  %v375_v45 = vld [vmem:[#allocation2] sm:$0x1]  ;;  %v578_v61 = vld [vmem:[#allocation5] sm:$0xf] (!%p769_p4) }
 0x16a   : > { %412 = vmatprep.subr.mxu0 %v408_v22  ;;  %482 = vmatprep.subr.mxu1 %v409_v23  ;;  %v405_v48 = vld [vmem:[#allocation4] sm:$0xf]  ;;  %v561_v57 = vshrl.u32 (!%p769_p4), %v560_v55, 7  ;;  %v563_v58 = vand.u32 (!%p769_p4), 127, %v560_v55  ;;  %v591_v62 = vsel (!%p769_p4), %vm553_vm5, %v578_v61, 0.0 }
 0x16b   : > { %v376_v27 = vmul.f32 %v373_v25, %v373_v25  ;;  %413 = vmatpush1.xpose.msra.mxu0 %v371_v19  ;;  %483 = vmatpush1.xpose.msra.mxu1 %v372_v20  ;;  %v377_v28 = vmul.f32 %v374_v26, %v374_v26 }
 0x16c   : > { %476 = vmatprep.mubr.f32.mxu0 %v408_v22  ;;  %546 = vmatprep.mubr.f32.mxu1 %v409_v23  ;;  %vm564_vm6 = vcmp.eq.s32.totalorder (!%p769_p4), %v561_v57, %v563_v58 }
 0x16d   : > { %v380_v29 = vcombine.high %v376_v27, %v376_v27  ;;  %v385_v30 = vsel %vm384_vm3, %v376_v27, 0.0  ;;  %v381_v31 = vcombine.high %v377_v28, %v377_v28  ;;  %v388_v33 = vsel %vm384_vm3, %v377_v28, 0.0  ;;  %592 = vadd.xlane.f32.xlu1 (!%p769_p4), %v591_v62  ;;  %v610_v12 = vld [vmem:[#allocation3] sm:$0x1] (!%p769_p4) }
 0x16e   : > { %477 = vmatmul.mubr.f32.vlgmr.msra.gmra.mrb[0].mxu0 %v371_v19  ;;  %547 = vmatmul.mubr.f32.vlgmr.msra.gmra.mrb[0].mxu1 %v372_v20  ;;  %611 = vst.msk [vmem:[#allocation13] sm:$0x1] (!%p769_p4), %vm403_vm4, %v610_v12 }
 0x16f   : > { %v386_v32 = vsel %vm384_vm3, %v380_v29, 0.0  ;;  %v390_v35 = vsel %vm384_vm3, %v381_v31, 0.0 }
 0x170   : > { %v387_v34 = vadd.f32 %v386_v32, %v385_v30 }
 0x172   : > { %v389_v36 = vadd.f32 %v388_v33, %v387_v34 }
 0x174   : > { %v391_v37 = vadd.f32 %v390_v35, %v389_v36 }
 0x176   : > { %392 = vadd.xlane.f32.xlu0 %v391_v37 }
 0x1fa   : > { %v593_v13 = vpop.xlane.xlu1 (!%p769_p4), %592 }
 0x1fb   : > { %v594_v14 = vrot.slane (!%p769_p4), %v593_v13, 4 }
 0x1fd   : > { %v595_v15 = vadd.f32 (!%p769_p4), %v594_v14, %v593_v13 }
 0x1ff   : > { %v596_v16 = vrot.slane (!%p769_p4), %v595_v15, 2 }
 0x201   : > { %v597_v20 = vadd.f32 (!%p769_p4), %v596_v16, %v595_v15 }
 0x203   : > { %v393_v38 = vpop.xlane.xlu0 %392  ;;  %v598_v23 = vrot.slane (!%p769_p4), %v597_v20, 1 }
 0x204   : > { %v394_v39 = vrot.slane %v393_v38, 4 }
 0x205   : > { %v599_v26 = vadd.f32 (!%p769_p4), %v598_v23, %v597_v20 }
 0x206   : > { %v395_v40 = vadd.f32 %v394_v39, %v393_v38 }
 0x208   : > { %v396_v41 = vrot.slane %v395_v40, 2 }
 0x20a   : > { %v397_v42 = vadd.f32 %v396_v41, %v395_v40 }
 0x20c   : > { %v398_v43 = vrot.slane %v397_v42, 1 }
 0x20e   : > { %v399_v44 = vadd.f32 %v398_v43, %v397_v42 }
 0x210   : > { %782 = vpush %v399_v44 }
 0x240   : > { %558 = sbr.rel (%p769_p4) target bundleno = 964 (0x3c4), region = 64 }
 0x241   : > { %s783_s22 = spop %782  ;;  %v478_v47 = vpop.f32.mrb[0].mxu0  ;;  %v548_v49 = vpop.f32.mrb[0].mxu1 }
 0x242   : > { %v401_v46 = vstv %s783_s22  ;;  %v549_v51 = vadd.f32 %v548_v49, %v478_v47  ;;  %v480_v52 = vpop.f32.mrb[1].mxu0  ;;  %v550_v53 = vpop.f32.mrb[1].mxu1 }
 0x243   : > { %v402_v50 = vadd.f32 %v401_v46, %v375_v45 }
 0x244   : > { %v552_v54 = vadd.f32 %v549_v51, %v405_v48 }
 0x245   : > { %404 = vst.msk [vmem:[#allocation2] sm:$0x1] %vm403_vm4, %v402_v50 }
 0x246   : > { %554 = vst.msk [vmem:[#allocation4] sm:$0xf] %vm553_vm5, %v552_v54 }
 0x24c   : > { %v608_v11 = vld [vmem:[#allocation2] sm:$0x1] }
 0x24d   : > { %v559_v56 = vld [vmem:[#allocation4] sm:$0xf]  ;;  %609 = vst.msk [vmem:[#allocation12] sm:$0x1] %vm403_vm4, %v608_v11 }
 0x24e   : > { %v565_v59 = vsel %vm564_vm6, %v559_v56, 0.0  ;;  %v576_v5 = vmul.f32 2.0, %v559_v56 }
 0x24f   : > { %v566_v60 = vsel %vm553_vm5, %v565_v59, 0.0 }
 0x250   : > { %567 = vadd.xlane.f32.xlu0 %v566_v60  ;;  %v569_v63 = vrot.slane %v566_v60, 4 }
 0x252   : > { %v570_v0 = vadd.f32 %v569_v63, %v566_v60 }
 0x254   : > { %v571_v1 = vrot.slane %v570_v0, 2 }
 0x256   : > { %v572_v2 = vadd.f32 %v571_v1, %v570_v0 }
 0x258   : > { %v573_v3 = vrot.slane %v572_v2, 1 }
 0x25a   : > { %v574_v4 = vadd.f32 %v573_v3, %v572_v2 }
 0x2dd   : > { %v568_v6 = vpop.xlane.xlu0 %567 }
 0x2de   : > { %v575_v7 = vadd.f32 %v574_v4, %v568_v6 }
 0x2e0   : > { %v577_v8 = vsub.f32 %v575_v7, %v576_v5 }
 0x2e2   : > { %v579_v9 = vmul.f32 %v578_v61, %v577_v8 }
 0x2e4   : > { %v580_v10 = vsel %vm553_vm5, %v579_v9, 0.0 }
 0x2e5   : > { %581 = vadd.xlane.f32.xlu0 %v580_v10 }
 0x372   : > { %v582_v17 = vpop.xlane.xlu0 %581 }
 0x373   : > { %v583_v18 = vrot.slane %v582_v17, 4 }
 0x375   : > { %v584_v19 = vadd.f32 %v583_v18, %v582_v17 }
 0x377   : > { %v585_v21 = vrot.slane %v584_v19, 2 }
 0x379   : > { %v586_v22 = vadd.f32 %v585_v21, %v584_v19 }
 0x37b   : > { %v587_v24 = vrot.slane %v586_v22, 1 }
 0x37d   : > { %v588_v25 = vadd.f32 %v587_v24, %v586_v22 }
 0x37f   : > { %784 = vpush %v588_v25 }
 0x380   : > { %786 = vpush %v599_v26 }
 0x3b0   : > { %s785_s27 = spop %784 }
 0x3b1   : > { %s787_s15 = spop %786  ;;  %v590_v29 = vstv %s785_s27 }
 0x3b2   : > { %v601_v27 = vstv %s787_s15  ;;  %v603_v30 = vmul.f32 0.0009765625, %v590_v29 }
 0x3b3   : > { %v604_v28 = vmax.f32 %v601_v27, 1.0  ;;  %vm602_vm7 = vcmp.gt.f32.partialorder %v601_v27, 0.0 }
 0x3b5   : > { %879 = vrcp.f32 %v604_v28 }
 0x3bf   : > { %v880_v31 = vpop.eup %879 }
 0x3c0   : > { %v606_v32 = vmul.f32 %v880_v31, %v603_v30 }
 0x3c2   : > { %v607_v33 = vsel %vm602_vm7, %v606_v32, 0.0 }
 0x3c3   : > { %612 = vst.msk [vmem:[#allocation15] sm:$0x1] %vm403_vm4, %v607_v33 }
 0x3c4 PF: > { %p831_p2 = scmp.eq.s32.totalorder %s1194_s28, 1  ;;  %s1132_s20 = smov [#allocation13]  }
 0x3c5   : > { %s631_s13 = sshll.u32 %s1132_s20, 4  ;;  %s1133_s16 = smov [#allocation12]   ;;  %s632_s13 = int_to_ptr.vmem [resolvable:$true] %s631_s13 }
 0x3c6   : > { %s620_s17 = sshll.u32 %s1133_s16, 4  ;;  %s997_s24 = scalar_lea.vmem %s632_s13, 16  ;;  %s621_s17 = int_to_ptr.vmem [resolvable:$true] %s620_s17 }
 0x3c7   : > { %p998_p10 = scmp.ne.s32.totalorder %s632_s13, %s997_s24  ;;  %s1003_s18 = scalar_lea.vmem %s632_s13, 32 }
 0x3c8   : > { %p1004_p6 = scmp.lt.s32.totalorder %s632_s13, %s632_s13  ;;  %p1005_p8 = scmp.lt.s32.totalorder %s1003_s18, %s997_s24 }
 0x3c9   : > { %p999_p12 = pnand %p998_p10, %p831_p2 }
 0x3ca   : > { %p1006_p5 = por %p1005_p8, %p1004_p6 }
 0x3cb   : > { %p1000_p1 = pneg %p999_p12 }
 0x3cd   : > { %p1007_p9 = pnand %p1006_p5, %p1000_p1 }
 0x3cf   : > { %1010 = shalt.err (!%p1007_p9)
}
 0x3d0   : > { %s1011_s19 = scalar_lea.hbm %s1491_s6, 16 }
 0x3d1   : > { %p1012_p11 = scmp.ne.s32.totalorder %s1491_s6, %s1011_s19  ;;  %p1017_p13 = scmp.lt.u32.totalorder %s1011_s19, %s1491_s6 }
 0x3d3   : > { %p1013_p0 = pnand %p1012_p11, %p831_p2 }
 0x3d5   : > { %p1014_p3 = pneg %p1013_p0 }
 0x3d7   : > { %p1019_p7 = pnand %p1017_p13, %p1014_p3 }
 0x3d9   : > { %1022 = shalt.err (!%p1019_p7)
}
 0x3da   : > { %803 = dma.vmem_to_hbm [thread:$0]  (%p831_p2), %s632_s13, 16, %s1491_s6, [#allocation14]  }
 0x3db   : > { %s1023_s22 = scalar_lea.vmem %s621_s17, 16  ;;  %s1029_s27 = scalar_lea.vmem %s621_s17, 32 }
 0x3dc   : > { %p1024_p4 = scmp.ne.s32.totalorder %s621_s17, %s1023_s22  ;;  %p1030_p1 = scmp.lt.s32.totalorder %s621_s17, %s621_s17 }
 0x3dd   : > { %p1031_p6 = scmp.lt.s32.totalorder %s1029_s27, %s1023_s22 }
 0x3de   : > { %p1025_p10 = pnand %p1024_p4, %p831_p2 }
 0x3df   : > { %p1032_p8 = por %p1031_p6, %p1030_p1 }
 0x3e0   : > { %p1026_p12 = pneg %p1025_p10 }
 0x3e2   : > { %p1033_p5 = pnand %p1032_p8, %p1026_p12 }
 0x3e4   : > { %1036 = shalt.err (!%p1033_p5)
}
 0x3e5   : > { %s1037_s16 = scalar_lea.hbm %s1490_s5, 16 }
 0x3e6   : > { %p1038_p9 = scmp.ne.s32.totalorder %s1490_s5, %s1037_s16  ;;  %p1043_p3 = scmp.lt.u32.totalorder %s1037_s16, %s1490_s5 }
 0x3e8   : > { %p1039_p11 = pnand %p1038_p9, %p831_p2 }
 0x3ea   : > { %p1040_p0 = pneg %p1039_p11 }
 0x3ec   : > { %p1045_p13 = pnand %p1043_p3, %p1040_p0 }
 0x3ee   : > { %1048 = shalt.err (!%p1045_p13)
}
 0x3ef   : > { %801 = dma.vmem_to_hbm [thread:$0]  (%p831_p2), %s621_s17, 16, %s1490_s5, [#allocation7]  }
 0x3f0   : > { %s1134_s30 = smov [#allocation15]  }
 0x3f1   : > { %s642_s9 = sshll.u32 %s1134_s30, 4  ;;  %s643_s9 = int_to_ptr.vmem [resolvable:$true] %s642_s9 }
 0x3f2   : > { %s1049_s21 = scalar_lea.vmem %s643_s9, 16  ;;  %s1055_s12 = scalar_lea.vmem %s643_s9, 32 }
 0x3f3   : > { %p1050_p7 = scmp.ne.s32.totalorder %s643_s9, %s1049_s21  ;;  %p1056_p12 = scmp.lt.s32.totalorder %s643_s9, %s643_s9 }
 0x3f4   : > { %p1057_p1 = scmp.lt.s32.totalorder %s1055_s12, %s1049_s21 }
 0x3f5   : > { %p1051_p4 = pnand %p1050_p7, %p831_p2 }
 0x3f6   : > { %p1058_p6 = por %p1057_p1, %p1056_p12 }
 0x3f7   : > { %p1052_p10 = pneg %p1051_p4 }
 0x3f9   : > { %p1059_p8 = pnand %p1058_p6, %p1052_p10 }
 0x3fb   : > { %1062 = shalt.err (!%p1059_p8)
}
 0x3fc   : > { %s1063_s22 = scalar_lea.hbm %s1492_s7, 16 }
 0x3fd   : > { %p1064_p5 = scmp.ne.s32.totalorder %s1492_s7, %s1063_s22  ;;  %p1069_p0 = scmp.lt.u32.totalorder %s1063_s22, %s1492_s7 }
 0x3ff   : > { %p1065_p9 = pnand %p1064_p5, %p831_p2 }
 0x401   : > { %p1066_p11 = pneg %p1065_p9 }
 0x403   : > { %p1071_p3 = pnand %p1069_p0, %p1066_p11 }
 0x405   : > { %1074 = shalt.err (!%p1071_p3)
}
 0x406   : > { %805 = dma.vmem_to_hbm [thread:$0]  (%p831_p2), %s643_s9, 16, %s1492_s7, [#allocation14]  }
 0x407   : > { %1104 = dma.done.wait (%p831_p2), [#allocation7], 16  }
 0x408   : > { %1106 = vsyncadd (%p831_p2), [#allocation7], 4294967280 }
 0x409   : > { %1108 = dma.done.wait (%p831_p2), [#allocation14], 32  }
 0x40a   : > { %1110 = vsyncadd (%p831_p2), [#allocation14], 4294967264 }
 0x40b PF: > { %p19_p13 = scmp.ge.s32.totalorder %s1214_s10, 4   ;;  %s1521_s24 = smov %s1117_s25 }
 0x40c   : > { %s1522_s25 = smov %s1121_s26  ;;  %s1523_s26 = smov %s1256_s8 }
 0x40d   : > { %s1524_s27 = smov %s1214_s10  ;;  %21 = sbr.rel (!%p19_p13) target bundleno = 5 (0x5), region = 119 }
 0x414   :  { %663 = vsyncpa [#allocation6], 1 }
 0x415   :  { %665 = vsyncpa [#allocation6 + $0x1], 1 }
 0x416   :  { %666 = vsyncpa [#allocation9], 1 }
 0x417   :  { %667 = vsyncpa [#allocation7], 1 }
 0x418   :  { %669 = vsyncpa [#allocation7 + $0x1], 1 }
 0x419   :  { %670 = vsyncpa [#allocation14], 1 }

</bundles_post_ra>
